<compile_context>
chip_gen: v7x
topology: tpu7x:2x2x1
jax: 0.10.0
libtpu: 0.0.40
codegen_flags: <defaults>
</compile_context>

<pallas_src>
import functools

import jax
import jax.numpy as jnp
import numpy as np
from jax import lax
from jax.experimental import pallas as pl
from jax.experimental.pallas import tpu as pltpu


def _cdiv(a, b):
    return -(-a // b)


def _round_up(x, m):
    return ((x + m - 1) // m) * m


def _vmem_limit_bytes():
    """Scoped VMEM request: cap-16MiB headroom, never more than 64 MiB.

    v7x (64 MiB physical) -> 48 MiB; v5e/v6e (128 MiB physical) -> 64 MiB.
    """
    try:
        info = pltpu.get_tpu_info()
        cap = int(getattr(info, "vmem_capacity_bytes", 0)) or 128 * 1024 * 1024
    except Exception:
        cap = 128 * 1024 * 1024
    return max(16 * 1024 * 1024, min(cap - 16 * 1024 * 1024, 64 * 1024 * 1024))


def _choose_batch_tile(B, N, itemsize_pair, vmem_limit, gran):
    """Largest batch tile such that the double-buffered input blocks plus the
    in-kernel f32 temporaries fit in ~80% of the VMEM limit, while keeping
    ~4 grid steps for pipelining / megacore when the batch allows it."""
    np128 = _round_up(max(N, 1), 128)          # VMEM lane padding
    budget = (vmem_limit * 4) // 5
    # 2 pipeline buffers per input + ~4 f32-sized compute temporaries per row
    per_row_bytes = np128 * (2 * itemsize_pair + 4 * 4)
    rows = budget // per_row_bytes
    rows = max(gran, (rows // gran) * gran)     # sublane-packing granularity

    # keep >= ~4 grid steps when possible (DMA/compute overlap, 2 TCs on v7x)
    target_tiles = 4
    tb_cap = _round_up(_cdiv(B, target_tiles), gran)
    tb = max(gran, min(rows, tb_cap))

    if tb >= B:
        # single tile covering the whole batch: block dim == full array dim,
        # so no divisibility constraint applies.
        tb = B
    return tb


@jax.jit
def _vae_loss_impl(logits, y, kl, beta):
    B, N = logits.shape

    itemsize_pair = logits.dtype.itemsize + y.dtype.itemsize
    # sublane packing: 8 rows/vreg for 32-bit, 16 for bf16, 32 for 8-bit
    gran = max(8, 32 // logits.dtype.itemsize, 32 // y.dtype.itemsize)
    vmem_limit = _vmem_limit_bytes()
    tb = _choose_batch_tile(B, N, itemsize_pair, vmem_limit, gran)
    num_tiles = _cdiv(B, tb)

    def kernel(logits_ref, y_ref, out_ref):
        # (tb, N) blocks; N is the full item axis (no wrapper-side padding).
        x = logits_ref[...].astype(jnp.float32)
        yv = y_ref[...].astype(jnp.float32)

        # numerically stable log-softmax denominator along the item axis
        m = jnp.max(x, axis=1, keepdims=True)                       # (tb, 1)
        lse = jnp.log(jnp.sum(jnp.exp(x - m), axis=1, keepdims=True)) + m

        # direct form sum((x - lse) * y): no cancellation issue for dense y
        contrib = jnp.sum((x - lse) * yv, axis=1, keepdims=True)    # (tb, 1)

        # mask rows of the (possibly partial) last batch tile
        row = pl.program_id(0) * tb + lax.broadcasted_iota(
            jnp.int32, contrib.shape, 0)
        contrib = jnp.where(row < B, contrib, jnp.float32(0.0))

        partial = jnp.sum(contrib)                                  # scalar
        out_ref[...] = jnp.full(out_ref.shape, partial, dtype=jnp.float32)

    cost = pl.CostEstimate(
        flops=6 * B * N,
        transcendentals=B * N,
        bytes_accessed=B * N * itemsize_pair + num_tiles * 8 * 128 * 4,
    )

    partials = pl.pallas_call(
        kernel,
        out_shape=jax.ShapeDtypeStruct((num_tiles, 8, 128), jnp.float32),
        grid_spec=pltpu.PrefetchScalarGridSpec(
            num_scalar_prefetch=0,
            grid=(num_tiles,),
            in_specs=[
                pl.BlockSpec((tb, N), lambda i: (i, 0)),   # logits
                pl.BlockSpec((tb, N), lambda i: (i, 0)),   # y
            ],
            out_specs=pl.BlockSpec((1, 8, 128), lambda i: (i, 0, 0)),
        ),
        compiler_params=pltpu.CompilerParams(
            # tiles are independent -> both TensorCores stream on v7x
            dimension_semantics=("parallel",),
            vmem_limit_bytes=vmem_limit,
        ),
        cost_estimate=cost,
    )(logits, y)

    total = jnp.sum(partials[:, 0, 0])
    neg_ll = -total / jnp.float32(B)
    wkl = (beta * kl).astype(jnp.float32)
    loss = neg_ll + wkl
    return loss, neg_ll, wkl


def vae_loss_forward(logits, y, KL, curr_beta):
    """Returns (loss, {'nll': nll, 'KL': weighted_KL}) matching VAELoss.forward.

    logits and y may be bf16 (kernel is HBM-bound, so this ~halves traffic);
    all math inside the kernel is float32.
    """
    kl = jnp.asarray(KL, jnp.float32)
    beta = jnp.asarray(curr_beta, jnp.float32)
    loss, nll, wkl = _vae_loss_impl(logits, y, kl, beta)
    return loss, {"nll": nll, "KL": wkl}


class VAELossPallas:
    """Mirror of the PyTorch VAELoss module (forward implemented in Pallas).

    beta_step is pure Python host-side bookkeeping, kept identical.
    """

    def __init__(self, beta=None, beta_cap=0.5, beta_steps=2000, beta_patience=5):
        self.beta = beta
        self.beta_cap = beta_cap
        self.beta_steps = beta_steps
        self._curr_beta = 0
        if beta is not None:
            self._curr_beta = beta
        self.patience = beta_patience
        self._n_steps_wo_increase = 0
        self._best_score = -np.inf

    def forward(self, logits, KL, y):
        return vae_loss_forward(logits, y, KL, self._curr_beta)

    # TODO(synk): beta annealing is host-side Python state, not a kernel.
    def beta_step(self, score):
        if self.beta is not None:
            return self._curr_beta
        if self._n_steps_wo_increase > self.patience:
            return self._curr_beta
        if self._best_score > score:
            self._n_steps_wo_increase += 1
        else:
            self._best_score = score
            self._n_steps_wo_increase = 0
        self._curr_beta += self.beta_cap / self.beta_steps
        self._curr_beta = min(self.beta_cap, self._curr_beta)
        return self._curr_beta


if __name__ == "__main__":
    key = jax.random.PRNGKey(0)
    k1, k2, k3, k4 = jax.random.split(key, 4)

    KL, beta = 3.7, 0.25
    mod = VAELossPallas(beta=beta)

    # --- test 1: aligned shapes, bf16 targets (0/1 -> exact in bf16) ---
    B, N = 16, 256
    logits = jax.random.normal(k1, (B, N), dtype=jnp.float32)
    y = (jax.random.uniform(k2, (B, N)) < 0.1).astype(jnp.bfloat16)

    loss, parts = mod.forward(logits, KL, y)
    loss = jax.block_until_ready(loss)

    y32 = y.astype(jnp.float32)
    logp_ref = jax.nn.log_softmax(logits, axis=1)
    neg_ll_ref = -jnp.mean(jnp.sum(logp_ref * y32, axis=1))
    loss_ref = neg_ll_ref + beta * KL
    np.testing.assert_allclose(np.asarray(loss), np.asarray(loss_ref),
                               rtol=1e-5, atol=1e-4)
    np.testing.assert_allclose(np.asarray(parts["nll"]), np.asarray(neg_ll_ref),
                               rtol=1e-5, atol=1e-4)
    np.testing.assert_allclose(np.asarray(parts["KL"]), beta * KL,
                               rtol=1e-6, atol=1e-6)

    # --- test 2: ragged shapes (partial last batch tile + non-128 item axis),
    #             dense real-valued f32 targets ---
    B2, N2 = 13, 200
    logits2 = jax.random.normal(k3, (B2, N2), dtype=jnp.float32)
    y2 = jax.random.uniform(k4, (B2, N2), dtype=jnp.float32)

    loss2, parts2 = mod.forward(logits2, KL, y2)
    loss2 = jax.block_until_ready(loss2)

    logp2 = jax.nn.log_softmax(logits2, axis=1)
    neg_ll2 = -jnp.mean(jnp.sum(logp2 * y2, axis=1))
    np.testing.assert_allclose(np.asarray(parts2["nll"]), np.asarray(neg_ll2),
                               rtol=1e-5, atol=1e-4)
    np.testing.assert_allclose(np.asarray(loss2), np.asarray(neg_ll2 + beta * KL),
                               rtol=1e-5, atol=1e-4)

    print("KERNEL_OK")
</pallas_src>

<mosaic_0001>
module attributes {stable_mosaic.version = 11 : i64} {
  func.func @kernel(%arg0: i32, %arg1: memref<16x256xf32, #tpu.memory_space<vmem>>, %arg2: memref<16x256xbf16, #tpu.memory_space<vmem>>, %arg3: memref<1x8x128xf32, #tpu.memory_space<vmem>>) attributes {dimension_semantics = [#tpu.dimension_semantics<parallel>], iteration_bounds = array<i64: 1>, scalar_prefetch = 0 : i64, scratch_operands = 0 : i64, tpu.core_type = #tpu.core_type<tc>, window_params = [{transform_indices = @transform_0, window_bounds = array<i64: 16, 256>}, {transform_indices = @transform_1, window_bounds = array<i64: 16, 256>}, {transform_indices = @transform_2, window_bounds = array<i64: 1, 8, 128>}]} {
    %c0 = arith.constant 0 : index
    %c0_0 = arith.constant 0 : index
    %0 = vector.load %arg1[%c0, %c0_0] : memref<16x256xf32, #tpu.memory_space<vmem>>, vector<16x256xf32>
    %c0_1 = arith.constant 0 : index
    %c0_2 = arith.constant 0 : index
    %1 = vector.load %arg2[%c0_1, %c0_2] : memref<16x256xbf16, #tpu.memory_space<vmem>>, vector<16x256xbf16>
    %2 = arith.extf %1 : vector<16x256xbf16> to vector<16x256xf32>
    %cst = arith.constant dense<0xFF800000> : vector<16xf32>
    %3 = vector.multi_reduction <maximumf>, %0, %cst [1] : vector<16x256xf32> to vector<16xf32>
    %4 = vector.shape_cast %3 : vector<16xf32> to vector<16x1xf32>
    %5 = vector.broadcast %4 : vector<16x1xf32> to vector<16x256xf32>
    %6 = arith.subf %0, %5 : vector<16x256xf32>
    %7 = math.exp %6 : vector<16x256xf32>
    %cst_3 = arith.constant dense<0.000000e+00> : vector<16xf32>
    %8 = vector.multi_reduction <add>, %7, %cst_3 [1] : vector<16x256xf32> to vector<16xf32>
    %9 = vector.shape_cast %8 : vector<16xf32> to vector<16x1xf32>
    %10 = math.log %9 : vector<16x1xf32>
    %11 = arith.addf %10, %4 : vector<16x1xf32>
    %12 = vector.broadcast %11 : vector<16x1xf32> to vector<16x256xf32>
    %13 = arith.subf %0, %12 : vector<16x256xf32>
    %14 = arith.mulf %13, %2 : vector<16x256xf32>
    %cst_4 = arith.constant dense<0.000000e+00> : vector<16xf32>
    %15 = vector.multi_reduction <add>, %14, %cst_4 [1] : vector<16x256xf32> to vector<16xf32>
    %16 = vector.shape_cast %15 : vector<16xf32> to vector<16x1xf32>
    %c16_i32 = arith.constant 16 : i32
    %17 = arith.muli %arg0, %c16_i32 : i32
    %18 = tpu.iota {dimensions = array<i32: 0>} : vector<16x1xi32>
    %19 = vector.broadcast %17 : i32 to vector<16x1xi32>
    %20 = arith.addi %19, %18 : vector<16x1xi32>
    %c16_i32_5 = arith.constant 16 : i32
    %21 = vector.broadcast %c16_i32_5 : i32 to vector<16x1xi32>
    %22 = arith.cmpi slt, %20, %21 : vector<16x1xi32>
    %cst_6 = arith.constant 0.000000e+00 : f32
    %23 = vector.broadcast %cst_6 : f32 to vector<16x1xf32>
    %24 = arith.select %22, %16, %23 : vector<16x1xi1>, vector<16x1xf32>
    %25 = vector.shape_cast %24 : vector<16x1xf32> to vector<1x16x1xf32>
    %cst_7 = arith.constant dense<0.000000e+00> : vector<1xf32>
    %26 = vector.multi_reduction <add>, %25, %cst_7 [1, 2] : vector<1x16x1xf32> to vector<1xf32>
    %27 = vector.shape_cast %26 : vector<1xf32> to vector<1x1x1xf32>
    %28 = vector.extract %27[0, 0, 0] : f32 from vector<1x1x1xf32>
    %29 = vector.broadcast %28 : f32 to vector<1x8x128xf32>
    %c0_8 = arith.constant 0 : index
    %c0_9 = arith.constant 0 : index
    %c0_10 = arith.constant 0 : index
    %30 = vector.load %arg3[%c0_8, %c0_9, %c0_10] : memref<1x8x128xf32, #tpu.memory_space<vmem>>, vector<1x8x128xf32>
    tpu.vector_store %arg3[%c0_8, %c0_9, %c0_10], %29 {strides = array<i32>} : memref<1x8x128xf32, #tpu.memory_space<vmem>>, vector<1x8x128xf32>,
    return
  }
  func.func @transform_0(%arg0: i32) -> (i32, i32) {
    %c0_i32 = arith.constant 0 : i32
    %c0_i32_0 = arith.constant 0 : i32
    return %arg0, %c0_i32 : i32, i32
  }
  func.func @transform_1(%arg0: i32) -> (i32, i32) {
    %c0_i32 = arith.constant 0 : i32
    %c0_i32_0 = arith.constant 0 : i32
    return %arg0, %c0_i32 : i32, i32
  }
  func.func @transform_2(%arg0: i32) -> (i32, i32, i32) {
    %c0_i32 = arith.constant 0 : i32
    %c0_i32_0 = arith.constant 0 : i32
    %c0_i32_1 = arith.constant 0 : i32
    return %arg0, %c0_i32, %c0_i32_0 : i32, i32, i32
  }
}

</mosaic_0001>

<bundles_post_ra>
// kernel: _vae_loss_impl.1
= control target key start
LH: loop header
LB: loop body
LE: loop exit
PB: predicated region body
PF: predicated region fallthrough
CT: control target
= control target key end

     0   :  { %7 = vsyncpa [#allocation3], 0  ;;  %s287_s0 = inlined_call_operand.hbm [shape: f32[16,256], index: 0, kind: input, shape index: {}]   ;;  %s288_s1 = inlined_call_operand.hbm [shape: bf16[16,256], index: 1, kind: input, shape index: {}]   ;;  %s289_s2 = inlined_call_operand.hbm [shape: f32[1,8,128], index: 2, kind: output, shape index: {}]  }
   0x1   :  { %8 = vsyncpa [#allocation6], 0 }
   0x2   :  { %9 = vsyncpa [#allocation4], 0  ;;  %s229_s9 = smov [#allocation2]   ;;  %s157_s13 = scalar_lea.hbm %s287_s0, 512 }
   0x3   :  { %s15_s10 = sshll.u32 %s229_s9, 4  ;;  %p158_p0 = scmp.ne.s32.totalorder %s287_s0, %s157_s13  ;;  %s16_s10 = int_to_ptr.vmem [resolvable:$true] %s15_s10 }
   0x4   :  { %p161_p1 = scmp.lt.u32.totalorder %s157_s13, %s287_s0 }
   0x6   :  { %p163_p2 = pnand %p161_p1, %p158_p0 }
   0x8   :  { %166 = shalt.err (!%p163_p2)
}
   0x9   :  { %s167_s18 = scalar_lea.vmem %s16_s10, 512  ;;  %p172_p4 = scmp.lt.s32.totalorder %s16_s10, %s16_s10 }
   0xa   :  { %p168_p3 = scmp.ne.s32.totalorder %s16_s10, %s167_s18  ;;  %p173_p5 = scmp.lt.s32.totalorder %s167_s18, %s167_s18 }
   0xc   :  { %p174_p6 = por %p173_p5, %p172_p4 }
   0xe   :  { %p175_p7 = pnand %p174_p6, %p168_p3 }
  0x10   :  { %178 = shalt.err (!%p175_p7)
}
  0x11   :  { %s230_s19 = smov 256   ;;  %s231_s20 = smov 16  }
  0x12   :  { %21 = dma.hbm_to_vmem [thread:$0]  %s287_s0, 512, %s16_s10, [#allocation3], %s230_s19, %s230_s19, %s231_s20  }
  0x13   :  { %s232_s23 = smov [#allocation5]   ;;  %s179_s27 = scalar_lea.hbm %s288_s1, 256 }
  0x14   :  { %s27_s24 = sshll.u32 %s232_s23, 4  ;;  %p180_p8 = scmp.ne.s32.totalorder %s288_s1, %s179_s27  ;;  %s28_s24 = int_to_ptr.vmem [resolvable:$true] %s27_s24 }
  0x15   :  { %p183_p9 = scmp.lt.u32.totalorder %s179_s27, %s288_s1 }
  0x17   :  { %p185_p10 = pnand %p183_p9, %p180_p8 }
  0x19   :  { %188 = shalt.err (!%p185_p10)
}
  0x1a   :  { %s189_s4 = scalar_lea.vmem %s28_s24, 256  ;;  %p194_p12 = scmp.lt.s32.totalorder %s28_s24, %s28_s24 }
  0x1b   :  { %p190_p11 = scmp.ne.s32.totalorder %s28_s24, %s189_s4  ;;  %p195_p13 = scmp.lt.s32.totalorder %s189_s4, %s189_s4 }
  0x1d   :  { %p196_p0 = por %p195_p13, %p194_p12 }
  0x1f   :  { %p197_p1 = pnand %p196_p0, %p190_p11 }
  0x21   :  { %200 = shalt.err (!%p197_p1)
}
  0x22   :  { %s233_s0 = smov 128   ;;  %s234_s5 = smov 8  }
  0x23   :  { %33 = dma.hbm_to_vmem [thread:$0]  %s288_s1, 256, %s28_s24, [#allocation6], %s233_s0, %s233_s0, %s234_s5  }
  0x24   :  { %223 = dma.done.wait [#allocation3], 512  }
  0x25   :  { %224 = vsyncadd [#allocation3], 4294966784 }
  0x26   :  { %225 = dma.done.wait [#allocation6], 256  }
  0x27   :  { %226 = vsyncadd [#allocation6], 4294967040  ;;  %v40_v0 = vld [vmem:[#allocation2] sm:$0xff]  ;;  %v41_v1 = vld [vmem:[#allocation2 + $0x8] sm:$0xff]  ;;  %vm105_vm0 = vcmask 7168   ;;  %s235_s1 = smov [#allocation7]  }
  0x28   :  { %v42_v2 = vld [vmem:[#allocation2 + $0x10] sm:$0xff]  ;;  %v50_v3 = vmax.f32 %v40_v0, %v41_v1  ;;  %v43_v4 = vld [vmem:[#allocation2 + $0x18] sm:$0xff]  ;;  %v44_v25 = vld [vmem:[#allocation5] sm:$0xff]  ;;  %s126_s8 = sshll.u32 %s235_s1, 4  ;;  %s127_s8 = int_to_ptr.vmem [resolvable:$true] %s126_s8 }
  0x29   :  { %v53_v5 = vmax.f32 %v42_v2, %v43_v4  ;;  %v46_v28 = vunpack.c.l.bf16 %v44_v25  ;;  %v47_v29 = vunpack.c.h.bf16 %v44_v25  ;;  %v45_v30 = vld [vmem:[#allocation5 + $0x8] sm:$0xff]  ;;  %s201_s10 = scalar_lea.vmem %s127_s8, 128  ;;  %p206_p3 = scmp.lt.s32.totalorder %s127_s8, %s127_s8 }
  0x2a   :  { %51 = vmax.xlane.f32.xlu0 %v50_v3  ;;  %v48_v35 = vunpack.c.l.bf16 %v45_v30  ;;  %v49_v39 = vunpack.c.h.bf16 %v45_v30  ;;  %p202_p2 = scmp.ne.s32.totalorder %s127_s8, %s201_s10  ;;  %p207_p4 = scmp.lt.s32.totalorder %s201_s10, %s201_s10 }
  0x2c   :  { %p208_p5 = por %p207_p4, %p206_p3 }
  0x2e   :  { %54 = vmax.xlane.f32.xlu0 %v53_v5  ;;  %p209_p6 = pnand %p208_p5, %p202_p2 }
  0xb7   :  { %v52_v6 = vpop.xlane.xlu0 %51 }
  0xb8   :  { %v56_v7 = vsub.f32 %v40_v0, %v52_v6  ;;  %v57_v8 = vsub.f32 %v41_v1, %v52_v6 }
  0xba   :  { %v60_v9 = vmul.f32 1.442695, %v56_v7  ;;  %v62_v10 = vmul.f32 1.442695, %v57_v8 }
  0xbb   :  { %v55_v11 = vpop.xlane.xlu0 %54 }
  0xbc   :  { %145 = vpow2.f32 %v60_v9  ;;  %v58_v12 = vsub.f32 %v42_v2, %v55_v11  ;;  %v59_v13 = vsub.f32 %v43_v4, %v55_v11 }
  0xbd   :  { %147 = vpow2.f32 %v62_v10 }
  0xbe   :  { %v64_v14 = vmul.f32 1.442695, %v58_v12  ;;  %v66_v15 = vmul.f32 1.442695, %v59_v13 }
  0xc0   :  { %149 = vpow2.f32 %v64_v14 }
  0xc1   :  { %151 = vpow2.f32 %v66_v15 }
  0xc6   :  { %v146_v16 = vpop.eup %145 }
  0xc7   :  { %v148_v17 = vpop.eup %147 }
  0xc8   :  { %v68_v18 = vadd.f32 %v148_v17, %v146_v16 }
  0xca   :  { %v150_v19 = vpop.eup %149  ;;  %69 = vadd.xlane.f32.xlu1 %v68_v18 }
  0xcb   :  { %v152_v20 = vpop.eup %151 }
  0xcc   :  { %v71_v21 = vadd.f32 %v152_v20, %v150_v19 }
  0xce   :  { %72 = vadd.xlane.f32.xlu1 %v71_v21 }
 0x157   :  { %v70_v22 = vpop.xlane.xlu1 %69 }
 0x158   :  { %153 = vlog2.f32 %v70_v22 }
 0x15b   :  { %v73_v23 = vpop.xlane.xlu1 %72 }
 0x15c   :  { %155 = vlog2.f32 %v73_v23 }
 0x162   :  { %v154_v24 = vpop.eup %153 }
 0x163   :  { %v75_v26 = vmul.f32 0.6931472, %v154_v24 }
 0x165   :  { %v78_v27 = vadd.f32 %v75_v26, %v52_v6 }
 0x166   :  { %v156_v31 = vpop.eup %155 }
 0x167   :  { %v77_v32 = vmul.f32 0.6931472, %v156_v31  ;;  %v80_v33 = vsub.f32 %v40_v0, %v78_v27  ;;  %v81_v34 = vsub.f32 %v41_v1, %v78_v27 }
 0x169   :  { %v79_v36 = vadd.f32 %v77_v32, %v55_v11  ;;  %v84_v37 = vmul.f32 %v80_v33, %v46_v28  ;;  %v85_v38 = vmul.f32 %v81_v34, %v47_v29 }
 0x16b   :  { %v88_v40 = vadd.f32 %v85_v38, %v84_v37  ;;  %v82_v41 = vsub.f32 %v42_v2, %v79_v36  ;;  %v83_v42 = vsub.f32 %v43_v4, %v79_v36 }
 0x16d   :  { %89 = vadd.xlane.f32.xlu0 %v88_v40  ;;  %v86_v43 = vmul.f32 %v82_v41, %v48_v35  ;;  %v87_v44 = vmul.f32 %v83_v42, %v49_v39 }
 0x16f   :  { %v91_v45 = vadd.f32 %v87_v44, %v86_v43 }
 0x171   :  { %92 = vadd.xlane.f32.xlu1 %v91_v45 }
 0x1fa   :  { %v90_v46 = vpop.xlane.xlu0 %89 }
 0x1fb   :  { %v106_v48 = vsel %vm105_vm0, %v90_v46, 0.0 }
 0x1fe   :  { %v93_v47 = vpop.xlane.xlu1 %92 }
 0x1ff   :  { %v107_v49 = vsel %vm105_vm0, %v93_v47, 0.0 }
 0x200   :  { %v108_v50 = vadd.f32 %v107_v49, %v106_v48 }
 0x202   :  { %109 = vadd.xlane.f32.xlu0 %v108_v50 }
 0x28f   :  { %v110_v51 = vpop.xlane.xlu0 %109 }
 0x290   :  { %v111_v52 = vrot.slane %v110_v51, 4 }
 0x292   :  { %v112_v53 = vadd.f32 %v111_v52, %v110_v51 }
 0x294   :  { %v113_v54 = vrot.slane %v112_v53, 2 }
 0x296   :  { %v114_v55 = vadd.f32 %v113_v54, %v112_v53 }
 0x298   :  { %v115_v56 = vrot.slane %v114_v55, 1 }
 0x29a   :  { %v116_v57 = vadd.f32 %v115_v56, %v114_v55 }
 0x29c   :  { %136 = vpush %v116_v57 }
 0x2cd   :  { %s137_s9 = spop %136 }
 0x2ce   :  { %v118_v58 = vstv %s137_s9 }
 0x2cf   :  { %119 = vst [vmem:[#allocation7] sm:$0xff] %v118_v58 }
 0x2d0   :  { %212 = shalt.err (!%p209_p6)
}
 0x2d1   :  { %s213_s13 = scalar_lea.hbm %s289_s2, 128 }
 0x2d2   :  { %p214_p7 = scmp.ne.s32.totalorder %s289_s2, %s213_s13  ;;  %p217_p8 = scmp.lt.u32.totalorder %s213_s13, %s289_s2 }
 0x2d4   :  { %p219_p9 = pnand %p217_p8, %p214_p7 }
 0x2d6   :  { %222 = shalt.err (!%p219_p9)
}
 0x2d7   :  { %129 = dma.vmem_to_hbm [thread:$0]  %s127_s8, 128, %s289_s2, [#allocation4]  }
 0x2d8   :  { %227 = dma.done.wait [#allocation4], 128  }
 0x2d9   :  { %228 = vsyncadd [#allocation4], 4294967168 }
 0x2da   :  { %133 = vsyncpa [#allocation3], 1 }
 0x2db   :  { %134 = vsyncpa [#allocation6], 1 }
 0x2dc   :  { %135 = vsyncpa [#allocation4], 1 }

</bundles_post_ra>
